<compile_context>
chip_gen: v7x
topology: tpu7x:2x2x1
jax: 0.10.0
libtpu: 0.0.40
codegen_flags: <defaults>
</compile_context>

<pallas_src>
import math

import jax
import jax.numpy as jnp
import numpy as np
from jax.experimental import pallas as pl
from jax.experimental.pallas import tpu as pltpu

_LANE = 128


def _round_up(x: int, m: int) -> int:
    return ((x + m - 1) // m) * m


def _tpu_budget():
    """Return (vmem_capacity_bytes, num_tensorcores) with safe fallbacks."""
    vmem_cap = 64 << 20
    num_cores = 2  # conservative default: v7x-like (64 MiB / 2 TCs)
    try:
        info = pltpu.get_tpu_info()
        vmem_cap = int(getattr(info, "vmem_capacity_bytes", vmem_cap))
        cores = (getattr(info, "num_cores", None)
                 or getattr(info, "tensorcore_count", None)
                 or getattr(info, "num_tensorcores", None))
        if cores:
            num_cores = int(cores)
        else:
            # v7x: 64 MiB VMEM per TC, 2 TCs/chip.  v5e/v6e: 128 MiB, 1 TC.
            num_cores = 2 if vmem_cap <= (64 << 20) else 1
    except Exception:
        pass
    return vmem_cap, num_cores


def _make_mlp_kernel(n_layers: int, negative_slope: float = 0.01):
    """Fused MLP forward: whole layer stack on one batch tile per grid step."""

    def kernel(*refs):
        x_ref = refs[0]
        o_ref = refs[-1]
        param_refs = refs[1:-1]  # (w0, b0, w1, b1, ..., w_{L-1}, b_{L-1})

        h = x_ref[...]
        for i in range(n_layers):
            w = param_refs[2 * i][...]
            b = param_refs[2 * i + 1][...].astype(jnp.float32)
            # MXU matmul in the parameter dtype (bf16 stays bf16 on v6e/v7x),
            # f32 accumulation; bias-add / LeakyReLU stay f32 (v5e-safe).
            h = jnp.dot(h.astype(w.dtype), w,
                        preferred_element_type=jnp.float32) + b
            if i < n_layers - 1:  # LeakyReLU on all but the last layer
                h = jnp.where(h > 0, h, negative_slope * h)
        o_ref[...] = h.astype(o_ref.dtype)

    return kernel


def feedforward_pallas(x, weights, biases, *, batch_tile=512, negative_slope=0.01,
                       param_dtype=None):
    """Run the fused MLP Pallas kernel.

    x:        [B, structure[0]]
    weights:  list of [in_i, out_i] arrays (already transposed vs. torch)
    biases:   list of [out_i] or [1, out_i] arrays
    param_dtype: optional dtype (e.g. jnp.bfloat16) to cast parameters to for
                 the bf16-native MXU on v6e/v7x.
    """
    B, in_dim = x.shape
    n_layers = len(weights)
    out_dim = weights[-1].shape[1]
    dims = [in_dim] + [w.shape[1] for w in weights]

    if param_dtype is not None:
        weights = [w.astype(param_dtype) for w in weights]
        biases = [jnp.asarray(b).astype(param_dtype) for b in biases]

    flat_params = []
    for w, b in zip(weights, biases):
        flat_params.append(w)
        flat_params.append(jnp.asarray(b).reshape(1, -1))

    vmem_cap, num_cores = _tpu_budget()

    # ---- batch tile: large (HBM/step-overhead bound kernel), MXU-aligned ----
    # Round to a multiple of 128 once B >= 128; split into >= num_cores steps
    # only where there are multiple TensorCores (v7x).  No batch padding: the
    # grid uses cdiv and the partial last block's OOB rows are masked on store.
    x_itemsize = jnp.dtype(x.dtype).itemsize
    min_tile = 8 * max(1, 4 // x_itemsize)          # (8,128) f32 / (16,128) bf16 / (32,128) int8
    row_align = _LANE if B >= _LANE else min_tile
    tile = min(int(batch_tile), _round_up(B, row_align))
    if num_cores > 1 and B >= num_cores * row_align:
        tile = min(tile, _round_up(pl.cdiv(B, num_cores), row_align))
    tile = max(row_align, (tile // row_align) * row_align)
    grid = pl.cdiv(B, tile)

    # ---- VMEM budget ---------------------------------------------------------
    param_bytes = sum(math.prod(p.shape) * p.dtype.itemsize for p in flat_params)
    io_bytes = 2 * tile * (in_dim * x_itemsize + out_dim * x_itemsize)   # double-buffered I/O tiles
    act_bytes = 3 * tile * _round_up(max(dims), _LANE) * 4               # f32 intermediates
    vmem_cap_limit = min(int(vmem_cap * 7 // 8), 112 << 20)              # ~56 MiB v7x, ~112 MiB v5e/v6e

    kernel = _make_mlp_kernel(n_layers, negative_slope)

    def call(single_buffer_params: bool):
        wb_kwargs = {"pipeline_mode": pl.Buffered(1)} if single_buffer_params else {}
        in_specs = [pl.BlockSpec((tile, in_dim), lambda i: (i, 0))]
        for p in flat_params:
            # Constant index map -> block is fetched once and stays resident.
            in_specs.append(pl.BlockSpec(p.shape, lambda i: (0, 0), **wb_kwargs))
        out_spec = pl.BlockSpec((tile, out_dim), lambda i: (i, 0))

        param_bufs = 1 if single_buffer_params else 2
        vmem_need = param_bufs * param_bytes + io_bytes + act_bytes + (4 << 20)
        # TODO(synk): add a K/N-tiled per-layer fallback (extra "arbitrary" grid
        # axis + f32 VMEM accumulator) when vmem_need exceeds vmem_cap_limit
        # (very wide hidden layers, especially on v7x's 64 MiB per-TC VMEM).
        vmem_limit = int(min(max(vmem_need, 32 << 20), vmem_cap_limit))

        return pl.pallas_call(
            kernel,
            out_shape=jax.ShapeDtypeStruct((B, out_dim), x.dtype),
            grid_spec=pltpu.PrefetchScalarGridSpec(
                num_scalar_prefetch=0,
                grid=(grid,),
                in_specs=in_specs,
                out_specs=out_spec,
            ),
            compiler_params=pltpu.CompilerParams(
                dimension_semantics=("parallel",),   # batch axis shards across TCs
                vmem_limit_bytes=vmem_limit,
            ),
        )(x, *flat_params)

    try:
        return call(True)    # single-buffered constant weight/bias blocks
    except Exception:
        return call(False)   # fall back to default double-buffering


def init_feedforward_params(structure, key):
    """Deterministic init matching nn.Linear's default U(-1/sqrt(fan_in), 1/sqrt(fan_in)).

    Returns weights already transposed to [in, out] and biases shaped [1, out].
    """
    weights, biases = [], []
    for i in range(len(structure) - 1):
        fan_in, fan_out = structure[i], structure[i + 1]
        k = 1.0 / math.sqrt(fan_in)
        key, wk, bk = jax.random.split(key, 3)
        w = jax.random.uniform(wk, (fan_in, fan_out), jnp.float32, -k, k)
        b = jax.random.uniform(bk, (1, fan_out), jnp.float32, -k, k)
        weights.append(w)
        biases.append(b)
    return weights, biases


def feedforward_reference(x, weights, biases, negative_slope=0.01):
    """Plain-JAX reference (mirrors the torch module semantics)."""
    h = x
    n = len(weights)
    for i in range(n):
        h = h @ weights[i] + biases[i]
        if i < n - 1:
            h = jnp.where(h > 0, h, negative_slope * h)
    return h


if __name__ == "__main__":
    # structure = [in, hidden1, hidden2, out] -> 2 x (Linear + LeakyReLU) + final Linear
    structure = [32, 64, 64, 16]

    key = jax.random.PRNGKey(0)
    weights, biases = init_feedforward_params(structure, key)

    # f32 parameter path: tiny batch, non-divisible batch (partial last tile),
    # and a multi-tile batch.
    for B in (4, 300, 640):
        key, xk = jax.random.split(key)
        x = jax.random.normal(xk, (B, structure[0]), jnp.float32)
        out = jax.block_until_ready(feedforward_pallas(x, weights, biases))
        ref = feedforward_reference(x, weights, biases)
        np.testing.assert_allclose(np.asarray(out), np.asarray(ref),
                                   rtol=1e-5, atol=1e-5)

    # bf16 MXU path (v6e/v7x fast path): params cast once, f32 accumulate +
    # f32 elementwise (required on v5e).  Looser tolerance for bf16 rounding.
    key, xk = jax.random.split(key)
    xb = jax.random.normal(xk, (256, structure[0]), jnp.float32)
    out_bf16 = jax.block_until_ready(
        feedforward_pallas(xb, weights, biases, param_dtype=jnp.bfloat16))
    ref_bf16 = feedforward_reference(xb, weights, biases)
    np.testing.assert_allclose(np.asarray(out_bf16), np.asarray(ref_bf16),
                               rtol=5e-2, atol=5e-2)

    print("KERNEL_OK")
</pallas_src>

<mosaic_0001>
module attributes {stable_mosaic.version = 11 : i64} {
  func.func @kernel(%arg0: i32, %arg1: memref<8x32xf32, #tpu.memory_space<vmem>>, %arg2: memref<32x64xf32, #tpu.memory_space<vmem>>, %arg3: memref<1x64xf32, #tpu.memory_space<vmem>>, %arg4: memref<64x64xf32, #tpu.memory_space<vmem>>, %arg5: memref<1x64xf32, #tpu.memory_space<vmem>>, %arg6: memref<64x16xf32, #tpu.memory_space<vmem>>, %arg7: memref<1x16xf32, #tpu.memory_space<vmem>>, %arg8: memref<8x16xf32, #tpu.memory_space<vmem>>) attributes {dimension_semantics = [#tpu.dimension_semantics<parallel>], iteration_bounds = array<i64: 1>, scalar_prefetch = 0 : i64, scratch_operands = 0 : i64, tpu.core_type = #tpu.core_type<tc>, window_params = [{transform_indices = @transform_0, window_bounds = array<i64: 8, 32>}, {pipeline_mode = #tpu.pipeline_mode<synchronous>, transform_indices = @transform_1, window_bounds = array<i64: 32, 64>}, {pipeline_mode = #tpu.pipeline_mode<synchronous>, transform_indices = @transform_2, window_bounds = array<i64: 1, 64>}, {pipeline_mode = #tpu.pipeline_mode<synchronous>, transform_indices = @transform_3, window_bounds = array<i64: 64, 64>}, {pipeline_mode = #tpu.pipeline_mode<synchronous>, transform_indices = @transform_4, window_bounds = array<i64: 1, 64>}, {pipeline_mode = #tpu.pipeline_mode<synchronous>, transform_indices = @transform_5, window_bounds = array<i64: 64, 16>}, {pipeline_mode = #tpu.pipeline_mode<synchronous>, transform_indices = @transform_6, window_bounds = array<i64: 1, 16>}, {transform_indices = @transform_7, window_bounds = array<i64: 8, 16>}]} {
    %c0 = arith.constant 0 : index
    %c0_0 = arith.constant 0 : index
    %0 = vector.load %arg1[%c0, %c0_0] : memref<8x32xf32, #tpu.memory_space<vmem>>, vector<8x32xf32>
    %c0_1 = arith.constant 0 : index
    %c0_2 = arith.constant 0 : index
    %1 = vector.load %arg2[%c0_1, %c0_2] : memref<32x64xf32, #tpu.memory_space<vmem>>, vector<32x64xf32>
    %c0_3 = arith.constant 0 : index
    %c0_4 = arith.constant 0 : index
    %2 = vector.load %arg3[%c0_3, %c0_4] : memref<1x64xf32, #tpu.memory_space<vmem>>, vector<1x64xf32>
    %cst = arith.constant dense<0.000000e+00> : vector<8x64xf32>
    %3 = tpu.matmul %0, %1, %cst {dimension_numbers = #tpu.dot_dimension_numbers<[1], [0], [0], [1], [0, 0, 1, 1], [], []>} : vector<8x32xf32>, vector<32x64xf32>, vector<8x64xf32> -> vector<8x64xf32>
    %4 = vector.broadcast %2 : vector<1x64xf32> to vector<8x64xf32>
    %5 = arith.addf %3, %4 : vector<8x64xf32>
    %cst_5 = arith.constant 0.000000e+00 : f32
    %6 = vector.broadcast %cst_5 : f32 to vector<8x64xf32>
    %7 = arith.cmpf ogt, %5, %6 : vector<8x64xf32>
    %cst_6 = arith.constant 0.00999999977 : f32
    %8 = vector.broadcast %cst_6 : f32 to vector<8x64xf32>
    %9 = arith.mulf %8, %5 : vector<8x64xf32>
    %10 = arith.select %7, %5, %9 : vector<8x64xi1>, vector<8x64xf32>
    %c0_7 = arith.constant 0 : index
    %c0_8 = arith.constant 0 : index
    %11 = vector.load %arg4[%c0_7, %c0_8] : memref<64x64xf32, #tpu.memory_space<vmem>>, vector<64x64xf32>
    %c0_9 = arith.constant 0 : index
    %c0_10 = arith.constant 0 : index
    %12 = vector.load %arg5[%c0_9, %c0_10] : memref<1x64xf32, #tpu.memory_space<vmem>>, vector<1x64xf32>
    %cst_11 = arith.constant dense<0.000000e+00> : vector<8x64xf32>
    %13 = tpu.matmul %10, %11, %cst_11 {dimension_numbers = #tpu.dot_dimension_numbers<[1], [0], [0], [1], [0, 0, 1, 1], [], []>} : vector<8x64xf32>, vector<64x64xf32>, vector<8x64xf32> -> vector<8x64xf32>
    %14 = vector.broadcast %12 : vector<1x64xf32> to vector<8x64xf32>
    %15 = arith.addf %13, %14 : vector<8x64xf32>
    %cst_12 = arith.constant 0.000000e+00 : f32
    %16 = vector.broadcast %cst_12 : f32 to vector<8x64xf32>
    %17 = arith.cmpf ogt, %15, %16 : vector<8x64xf32>
    %cst_13 = arith.constant 0.00999999977 : f32
    %18 = vector.broadcast %cst_13 : f32 to vector<8x64xf32>
    %19 = arith.mulf %18, %15 : vector<8x64xf32>
    %20 = arith.select %17, %15, %19 : vector<8x64xi1>, vector<8x64xf32>
    %c0_14 = arith.constant 0 : index
    %c0_15 = arith.constant 0 : index
    %21 = vector.load %arg6[%c0_14, %c0_15] : memref<64x16xf32, #tpu.memory_space<vmem>>, vector<64x16xf32>
    %c0_16 = arith.constant 0 : index
    %c0_17 = arith.constant 0 : index
    %22 = vector.load %arg7[%c0_16, %c0_17] : memref<1x16xf32, #tpu.memory_space<vmem>>, vector<1x16xf32>
    %cst_18 = arith.constant dense<0.000000e+00> : vector<8x16xf32>
    %23 = tpu.matmul %20, %21, %cst_18 {dimension_numbers = #tpu.dot_dimension_numbers<[1], [0], [0], [1], [0, 0, 1, 1], [], []>} : vector<8x64xf32>, vector<64x16xf32>, vector<8x16xf32> -> vector<8x16xf32>
    %24 = vector.broadcast %22 : vector<1x16xf32> to vector<8x16xf32>
    %25 = arith.addf %23, %24 : vector<8x16xf32>
    %c0_19 = arith.constant 0 : index
    %c0_20 = arith.constant 0 : index
    %26 = vector.load %arg8[%c0_19, %c0_20] : memref<8x16xf32, #tpu.memory_space<vmem>>, vector<8x16xf32>
    tpu.vector_store %arg8[%c0_19, %c0_20], %25 {strides = array<i32>} : memref<8x16xf32, #tpu.memory_space<vmem>>, vector<8x16xf32>,
    return
  }
  func.func @transform_0(%arg0: i32) -> (i32, i32) {
    %c0_i32 = arith.constant 0 : i32
    %c0_i32_0 = arith.constant 0 : i32
    return %arg0, %c0_i32 : i32, i32
  }
  func.func @transform_1(%arg0: i32) -> (i32, i32) {
    %c0_i32 = arith.constant 0 : i32
    %c0_i32_0 = arith.constant 0 : i32
    %c0_i32_1 = arith.constant 0 : i32
    return %c0_i32, %c0_i32_0 : i32, i32
  }
  func.func @transform_2(%arg0: i32) -> (i32, i32) {
    %c0_i32 = arith.constant 0 : i32
    %c0_i32_0 = arith.constant 0 : i32
    %c0_i32_1 = arith.constant 0 : i32
    return %c0_i32, %c0_i32_0 : i32, i32
  }
  func.func @transform_3(%arg0: i32) -> (i32, i32) {
    %c0_i32 = arith.constant 0 : i32
    %c0_i32_0 = arith.constant 0 : i32
    %c0_i32_1 = arith.constant 0 : i32
    return %c0_i32, %c0_i32_0 : i32, i32
  }
  func.func @transform_4(%arg0: i32) -> (i32, i32) {
    %c0_i32 = arith.constant 0 : i32
    %c0_i32_0 = arith.constant 0 : i32
    %c0_i32_1 = arith.constant 0 : i32
    return %c0_i32, %c0_i32_0 : i32, i32
  }
  func.func @transform_5(%arg0: i32) -> (i32, i32) {
    %c0_i32 = arith.constant 0 : i32
    %c0_i32_0 = arith.constant 0 : i32
    %c0_i32_1 = arith.constant 0 : i32
    return %c0_i32, %c0_i32_0 : i32, i32
  }
  func.func @transform_6(%arg0: i32) -> (i32, i32) {
    %c0_i32 = arith.constant 0 : i32
    %c0_i32_0 = arith.constant 0 : i32
    %c0_i32_1 = arith.constant 0 : i32
    return %c0_i32, %c0_i32_0 : i32, i32
  }
  func.func @transform_7(%arg0: i32) -> (i32, i32) {
    %c0_i32 = arith.constant 0 : i32
    %c0_i32_0 = arith.constant 0 : i32
    return %arg0, %c0_i32 : i32, i32
  }
}

module attributes {stable_mosaic.version = 11 : i64} {
  func.func @kernel(%arg0: i32, %arg1: memref<8x32xf32, #tpu.memory_space<vmem>>, %arg2: memref<32x64xf32, #tpu.memory_space<vmem>>, %arg3: memref<1x64xf32, #tpu.memory_space<vmem>>, %arg4: memref<64x64xf32, #tpu.memory_space<vmem>>, %arg5: memref<1x64xf32, #tpu.memory_space<vmem>>, %arg6: memref<64x16xf32, #tpu.memory_space<vmem>>, %arg7: memref<1x16xf32, #tpu.memory_space<vmem>>, %arg8: memref<8x16xf32, #tpu.memory_space<vmem>>) attributes {dimension_semantics = [#tpu.dimension_semantics<parallel>], iteration_bounds = array<i64: 1>, scalar_prefetch = 0 : i64, scratch_operands = 0 : i64, tpu.core_type = #tpu.core_type<tc>, window_params = [{transform_indices = @transform_0, window_bounds = array<i64: 8, 32>}, {pipeline_mode = #tpu.pipeline_mode<synchronous>, transform_indices = @transform_1, window_bounds = array<i64: 32, 64>}, {pipeline_mode = #tpu.pipeline_mode<synchronous>, transform_indices = @transform_2, window_bounds = array<i64: 1, 64>}, {pipeline_mode = #tpu.pipeline_mode<synchronous>, transform_indices = @transform_3, window_bounds = array<i64: 64, 64>}, {pipeline_mode = #tpu.pipeline_mode<synchronous>, transform_indices = @transform_4, window_bounds = array<i64: 1, 64>}, {pipeline_mode = #tpu.pipeline_mode<synchronous>, transform_indices = @transform_5, window_bounds = array<i64: 64, 16>}, {pipeline_mode = #tpu.pipeline_mode<synchronous>, transform_indices = @transform_6, window_bounds = array<i64: 1, 16>}, {transform_indices = @transform_7, window_bounds = array<i64: 8, 16>}]} {
    %c0 = arith.constant 0 : index
    %c0_0 = arith.constant 0 : index
    %0 = vector.load %arg1[%c0, %c0_0] : memref<8x32xf32, #tpu.memory_space<vmem>>, vector<8x32xf32>
    %c0_1 = arith.constant 0 : index
    %c0_2 = arith.constant 0 : index
    %1 = vector.load %arg2[%c0_1, %c0_2] : memref<32x64xf32, #tpu.memory_space<vmem>>, vector<32x64xf32>
    %c0_3 = arith.constant 0 : index
    %c0_4 = arith.constant 0 : index
    %2 = vector.load %arg3[%c0_3, %c0_4] : memref<1x64xf32, #tpu.memory_space<vmem>>, vector<1x64xf32>
    %cst = arith.constant dense<0.000000e+00> : vector<8x64xf32>
    %3 = tpu.matmul %0, %1, %cst {dimension_numbers = #tpu.dot_dimension_numbers<[1], [0], [0], [1], [0, 0, 1, 1], [], []>} : vector<8x32xf32>, vector<32x64xf32>, vector<8x64xf32> -> vector<8x64xf32>
    %4 = vector.broadcast %2 : vector<1x64xf32> to vector<8x64xf32>
    %5 = arith.addf %3, %4 : vector<8x64xf32>
    %cst_5 = arith.constant 0.000000e+00 : f32
    %6 = vector.broadcast %cst_5 : f32 to vector<8x64xf32>
    %7 = arith.cmpf ogt, %5, %6 : vector<8x64xf32>
    %cst_6 = arith.constant 0.00999999977 : f32
    %8 = vector.broadcast %cst_6 : f32 to vector<8x64xf32>
    %9 = arith.mulf %8, %5 : vector<8x64xf32>
    %10 = arith.select %7, %5, %9 : vector<8x64xi1>, vector<8x64xf32>
    %c0_7 = arith.constant 0 : index
    %c0_8 = arith.constant 0 : index
    %11 = vector.load %arg4[%c0_7, %c0_8] : memref<64x64xf32, #tpu.memory_space<vmem>>, vector<64x64xf32>
    %c0_9 = arith.constant 0 : index
    %c0_10 = arith.constant 0 : index
    %12 = vector.load %arg5[%c0_9, %c0_10] : memref<1x64xf32, #tpu.memory_space<vmem>>, vector<1x64xf32>
    %cst_11 = arith.constant dense<0.000000e+00> : vector<8x64xf32>
    %13 = tpu.matmul %10, %11, %cst_11 {dimension_numbers = #tpu.dot_dimension_numbers<[1], [0], [0], [1], [0, 0, 1, 1], [], []>} : vector<8x64xf32>, vector<64x64xf32>, vector<8x64xf32> -> vector<8x64xf32>
    %14 = vector.broadcast %12 : vector<1x64xf32> to vector<8x64xf32>
    %15 = arith.addf %13, %14 : vector<8x64xf32>
    %cst_12 = arith.constant 0.000000e+00 : f32
    %16 = vector.broadcast %cst_12 : f32 to vector<8x64xf32>
    %17 = arith.cmpf ogt, %15, %16 : vector<8x64xf32>
    %cst_13 = arith.constant 0.00999999977 : f32
    %18 = vector.broadcast %cst_13 : f32 to vector<8x64xf32>
    %19 = arith.mulf %18, %15 : vector<8x64xf32>
    %20 = arith.select %17, %15, %19 : vector<8x64xi1>, vector<8x64xf32>
    %c0_14 = arith.constant 0 : index
    %c0_15 = arith.constant 0 : index
    %21 = vector.load %arg6[%c0_14, %c0_15] : memref<64x16xf32, #tpu.memory_space<vmem>>, vector<64x16xf32>
    %c0_16 = arith.constant 0 : index
    %c0_17 = arith.constant 0 : index
    %22 = vector.load %arg7[%c0_16, %c0_17] : memref<1x16xf32, #tpu.memory_space<vmem>>, vector<1x16xf32>
    %cst_18 = arith.constant dense<0.000000e+00> : vector<8x16xf32>
    %23 = tpu.matmul %20, %21, %cst_18 {dimension_numbers = #tpu.dot_dimension_numbers<[1], [0], [0], [1], [0, 0, 1, 1], [], []>} : vector<8x64xf32>, vector<64x16xf32>, vector<8x16xf32> -> vector<8x16xf32>
    %24 = vector.broadcast %22 : vector<1x16xf32> to vector<8x16xf32>
    %25 = arith.addf %23, %24 : vector<8x16xf32>
    %c0_19 = arith.constant 0 : index
    %c0_20 = arith.constant 0 : index
    %26 = vector.load %arg8[%c0_19, %c0_20] : memref<8x16xf32, #tpu.memory_space<vmem>>, vector<8x16xf32>
    tpu.vector_store %arg8[%c0_19, %c0_20], %25 {strides = array<i32>} : memref<8x16xf32, #tpu.memory_space<vmem>>, vector<8x16xf32>,
    return
  }
  func.func @transform_0(%arg0: i32) -> (i32, i32) {
    %c0_i32 = arith.constant 0 : i32
    %c0_i32_0 = arith.constant 0 : i32
    return %arg0, %c0_i32 : i32, i32
  }
  func.func @transform_1(%arg0: i32) -> (i32, i32) {
    %c0_i32 = arith.constant 0 : i32
    %c0_i32_0 = arith.constant 0 : i32
    %c0_i32_1 = arith.constant 0 : i32
    return %c0_i32, %c0_i32_0 : i32, i32
  }
  func.func @transform_2(%arg0: i32) -> (i32, i32) {
    %c0_i32 = arith.constant 0 : i32
    %c0_i32_0 = arith.constant 0 : i32
    %c0_i32_1 = arith.constant 0 : i32
    return %c0_i32, %c0_i32_0 : i32, i32
  }
  func.func @transform_3(%arg0: i32) -> (i32, i32) {
    %c0_i32 = arith.constant 0 : i32
    %c0_i32_0 = arith.constant 0 : i32
    %c0_i32_1 = arith.constant 0 : i32
    return %c0_i32, %c0_i32_0 : i32, i32
  }
  func.func @transform_4(%arg0: i32) -> (i32, i32) {
    %c0_i32 = arith.constant 0 : i32
    %c0_i32_0 = arith.constant 0 : i32
    %c0_i32_1 = arith.constant 0 : i32
    return %c0_i32, %c0_i32_0 : i32, i32
  }
  func.func @transform_5(%arg0: i32) -> (i32, i32) {
    %c0_i32 = arith.constant 0 : i32
    %c0_i32_0 = arith.constant 0 : i32
    %c0_i32_1 = arith.constant 0 : i32
    return %c0_i32, %c0_i32_0 : i32, i32
  }
  func.func @transform_6(%arg0: i32) -> (i32, i32) {
    %c0_i32 = arith.constant 0 : i32
    %c0_i32_0 = arith.constant 0 : i32
    %c0_i32_1 = arith.constant 0 : i32
    return %c0_i32, %c0_i32_0 : i32, i32
  }
  func.func @transform_7(%arg0: i32) -> (i32, i32) {
    %c0_i32 = arith.constant 0 : i32
    %c0_i32_0 = arith.constant 0 : i32
    return %arg0, %c0_i32 : i32, i32
  }
}

</mosaic_0001>

<bundles_post_ra>
// kernel: tpu_custom_call.1
= control target key start
LH: loop header
LB: loop body
LE: loop exit
PB: predicated region body
PF: predicated region fallthrough
CT: control target
= control target key end

     0   :  { %12 = vsyncpa [#allocation3], 0  ;;  %s630_s0 = inlined_call_operand.vmem [shape: f32[4,32], index: 0, kind: input, shape index: {}]   ;;  %s631_s1 = inlined_call_operand.hbm [shape: f32[32,64], index: 1, kind: input, shape index: {}]   ;;  %s632_s2 = inlined_call_operand.vmem [shape: f32[1,64], index: 2, kind: input, shape index: {}]   ;;  %s633_s3 = inlined_call_operand.vmem [shape: f32[64,64], index: 3, kind: input, shape index: {}]   ;;  %s634_s4 = inlined_call_operand.vmem [shape: f32[1,64], index: 4, kind: input, shape index: {}]   ;;  %s635_s5 = inlined_call_operand.vmem [shape: f32[64,16], index: 5, kind: input, shape index: {}]   ;;  %s636_s6 = inlined_call_operand.vmem [shape: f32[1,16], index: 6, kind: input, shape index: {}]   ;;  %s637_s7 = inlined_call_operand.hbm [shape: f32[4,16], index: 7, kind: output, shape index: {}]  }
   0x1   :  { %13 = vsyncpa [#allocation4], 0  ;;  %s494_s24 = smov [#allocation2]   ;;  %s446_s28 = scalar_lea.hbm %s631_s1, 512 }
   0x2   :  { %s21_s25 = sshll.u32 %s494_s24, 4  ;;  %p447_p0 = scmp.ne.s32.totalorder %s631_s1, %s446_s28  ;;  %s22_s25 = int_to_ptr.vmem [resolvable:$true] %s21_s25 }
   0x3   :  { %p450_p1 = scmp.lt.u32.totalorder %s446_s28, %s631_s1 }
   0x5   :  { %p452_p2 = pnand %p450_p1, %p447_p0 }
   0x7   :  { %455 = shalt.err (!%p452_p2)
}
   0x8   :  { %s456_s10 = scalar_lea.vmem %s22_s25, 512  ;;  %p461_p4 = scmp.lt.s32.totalorder %s22_s25, %s22_s25 }
   0x9   :  { %p457_p3 = scmp.ne.s32.totalorder %s22_s25, %s456_s10  ;;  %p462_p5 = scmp.lt.s32.totalorder %s456_s10, %s456_s10 }
   0xb   :  { %p463_p6 = por %p462_p5, %p461_p4 }
   0xd   :  { %p464_p7 = pnand %p463_p6, %p457_p3 }
   0xf   :  { %467 = shalt.err (!%p464_p7)
}
  0x10   :  { %s495_s11 = smov 128   ;;  %s496_s12 = smov 8  }
  0x11   :  { %27 = dma.hbm_to_vmem [thread:$0]  %s631_s1, 512, %s22_s25, [#allocation3], %s495_s11, %s495_s11, %s496_s12  }
  0x12   :  { %490 = dma.done.wait [#allocation3], 512  }
  0x13   :  { %491 = vsyncadd [#allocation3], 4294966784  ;;  %v497_v0 = vmov 0.0|0.0   ;;  %vm498_vm0 = vmmov 0   ;;  %v499_v1 = vmov 0.0   ;;  %v42_v2 = vld [vmem:[#allocation2] sm:$0xff] }
  0x14   :  { %407 = vmatprep.subr.bf16.mxu0 %v497_v0  ;;  %366 = vmatprep.mubr.msk.f32.mxu0 %vm498_vm0, %v499_v1  ;;  %v43_v3 = vld [vmem:[#allocation2 + $0x8] sm:$0xff]  ;;  %v44_v4 = vld [vmem:[#allocation2 + $0x10] sm:$0xff]  ;;  %v45_v6 = vld [vmem:[#allocation2 + $0x18] sm:$0xff]  ;;  %vm53_vm1 = vcmask 261120   ;;  %vm145_vm3 = vcmask 523264   ;;  %vm310_vm5 = vcmask 130048  }
  0x15   :  { %413 = vmatprep.subr.bf16.mxu1 %v497_v0  ;;  %385 = vmatprep.mubr.msk.f32.mxu1 %vm498_vm0, %v499_v1  ;;  %v408_v5 = vpack.c.bf16 %v43_v3, %v42_v2  ;;  %v130_v7 = vld [vmem:[%s633_s3] sm:$0xff]  ;;  %v131_v8 = vld [vmem:[%s633_s3 + $0x8] sm:$0xff]  ;;  %v132_v9 = vld [vmem:[%s633_s3 + $0x10] sm:$0xff]  ;;  %v411_v11 = vpack.c.bf16 %v45_v6, %v44_v4 }
  0x16   :  { %v133_v10 = vld [vmem:[%s633_s3 + $0x18] sm:$0xff]  ;;  %v414_v12 = vpack.c.bf16 %v131_v8, %v130_v7  ;;  %v134_v14 = vld [vmem:[%s633_s3 + $0x20] sm:$0xff]  ;;  %v135_v15 = vld [vmem:[%s633_s3 + $0x28] sm:$0xff] }
  0x17   :  { %409 = vmatpush3.bf16.msra.mxu0 %v408_v5  ;;  %v417_v13 = vpack.c.bf16 %v133_v10, %v132_v9  ;;  %v41_v16 = vld [vmem:[%s630_s0] sm:$0xff]  ;;  %v420_v17 = vpack.c.bf16 %v135_v15, %v134_v14  ;;  %v136_v18 = vld [vmem:[%s633_s3 + $0x30] sm:$0xff]  ;;  %v137_v19 = vld [vmem:[%s633_s3 + $0x38] sm:$0xff] }
  0x18   :  { %410 = vmatprep.subr.bf16.mxu0 %v497_v0  ;;  %415 = vmatpush3.bf16.msra.mxu1 %v414_v12  ;;  %v423_v20 = vpack.c.bf16 %v137_v19, %v136_v18  ;;  %v222_v21 = vld [vmem:[%s635_s5] sm:$0xff]  ;;  %v223_v22 = vld [vmem:[%s635_s5 + $0x8] sm:$0xff]  ;;  %v224_v23 = vld [vmem:[%s635_s5 + $0x10] sm:$0xff] }
  0x19   :  { %416 = vmatprep.subr.bf16.mxu1 %v497_v0  ;;  %v426_v24 = vpack.c.bf16 %v223_v22, %v222_v21  ;;  %v225_v25 = vld [vmem:[%s635_s5 + $0x18] sm:$0xff]  ;;  %v226_v27 = vld [vmem:[%s635_s5 + $0x20] sm:$0xff]  ;;  %v227_v28 = vld [vmem:[%s635_s5 + $0x28] sm:$0xff] }
  0x1a   :  { %v429_v26 = vpack.c.bf16 %v225_v25, %v224_v23  ;;  %v432_v29 = vpack.c.bf16 %v227_v28, %v226_v27  ;;  %v329_v30 = vld [vmem:[%s632_s2] ss:$0 sm:$0xff]  ;;  %v228_v36 = vld [vmem:[%s635_s5 + $0x30] sm:$0xff]  ;;  %v229_v37 = vld [vmem:[%s635_s5 + $0x38] sm:$0xff] }
  0x1b   :  { %412 = vmatpush3.bf16.msra.mxu0 %v411_v11  ;;  %v435_v38 = vpack.c.bf16 %v229_v37, %v228_v36  ;;  %v331_v39 = vld [vmem:[%s634_s4] ss:$0 sm:$0xff] }
  0x1c   :  { %425 = vmatprep.subr.bf16.mxu0 %v497_v0  ;;  %418 = vmatpush3.bf16.msra.mxu1 %v417_v13  ;;  %v333_v45 = vld [vmem:[%s636_s6] ss:$0 sm:$0xff] }
  0x1d   :  { %419 = vmatprep.subr.bf16.mxu1 %v497_v0 }
  0x1e   :  { %367 = vmatmul.mubr.msk.f32.vlgmr.msra.gmra.mrb[0].mxu0 %vm53_vm1, %v41_v16 }
  0x1f   :  { %404 = vmatprep.mubr.msk.f32.mxu0 %vm498_vm0, %v499_v1  ;;  %427 = vmatpush3.bf16.msra.mxu0 %v426_v24 }
  0x20   :  { %421 = vmatpush3.bf16.msra.mxu1 %v420_v17  ;;  %428 = vmatprep.subr.bf16.mxu0 %v497_v0 }
  0x21   :  { %422 = vmatprep.subr.bf16.mxu1 %v497_v0 }
  0x23   :  { %430 = vmatpush3.bf16.msra.mxu0 %v429_v26 }
  0x24   :  { %424 = vmatpush3.bf16.msra.mxu1 %v423_v20  ;;  %431 = vmatprep.subr.bf16.mxu0 %v497_v0 }
  0x27   :  { %433 = vmatpush3.bf16.msra.mxu0 %v432_v29 }
  0x28   :  { %434 = vmatprep.subr.bf16.mxu0 %v497_v0 }
  0x2b   :  { %436 = vmatpush3.bf16.msra.mxu0 %v435_v38 }
  0xf1   :  { %v123_v31 = vpop.f32.mrb[0].mxu0 }
  0xf2   :  { %v124_v32 = vadd.f32 %v329_v30, %v123_v31  ;;  %v368_v33 = vpop.f32.mrb[1].mxu0 }
  0xf4   :  { %vm127_vm2 = vcmp.gt.f32.partialorder %v124_v32, 0.0  ;;  %v128_v34 = vmul.f32 0.01, %v124_v32 }
  0xf6   :  { %v129_v35 = vsel %vm127_vm2, %v124_v32, %v128_v34 }
  0xf7   :  { %386 = vmatmul.mubr.msk.f32.vlgmr.msra.gmra.mrb[0].mxu1 %vm145_vm3, %v129_v35 }
 0x1ca   :  { %v215_v40 = vpop.f32.mrb[0].mxu1 }
 0x1cb   :  { %v216_v41 = vadd.f32 %v331_v39, %v215_v40  ;;  %v387_v42 = vpop.f32.mrb[1].mxu1 }
 0x1cd   :  { %vm219_vm4 = vcmp.gt.f32.partialorder %v216_v41, 0.0  ;;  %v220_v43 = vmul.f32 0.01, %v216_v41 }
 0x1cf   :  { %v221_v44 = vsel %vm219_vm4, %v216_v41, %v220_v43 }
 0x1d0   :  { %405 = vmatmul.mubr.msk.f32.vlgmr.msra.gmra.mrb[2].mxu0 %vm145_vm3, %v221_v44 }
 0x2a3   :  { %v306_v46 = vpop.f32.mrb[2].mxu0 }
 0x2a4   :  { %v307_v47 = vadd.f32 %v333_v45, %v306_v46  ;;  %v406_v48 = vpop.f32.mrb[3].mxu0 }
 0x2a6   :  { %311 = vst.msk [vmem:[#allocation5] sm:$0xff] %vm310_vm5, %v307_v47 }
 0x2a7   :  { %316 = vsyncadd [#allocation4], 64  ;;  %s500_s5 = smov [#allocation5]  }
 0x2a8   :  { %s317_s27 = sshll.u32 %s500_s5, 4  ;;  %s318_s27 = int_to_ptr.vmem [resolvable:$true] %s317_s27 }
 0x2a9   :  { %s468_s4 = scalar_lea.vmem %s318_s27, 64  ;;  %s472_s28 = scalar_lea.vmem %s318_s27, 128 }
 0x2aa   :  { %p469_p8 = scmp.ne.s32.totalorder %s318_s27, %s468_s4  ;;  %p473_p9 = scmp.lt.s32.totalorder %s318_s27, %s318_s27 }
 0x2ab   :  { %p474_p10 = scmp.lt.s32.totalorder %s472_s28, %s468_s4 }
 0x2ad   :  { %p475_p11 = por %p474_p10, %p473_p9 }
 0x2af   :  { %p476_p12 = pnand %p475_p11, %p469_p8 }
 0x2b1   :  { %479 = shalt.err (!%p476_p12)
}
 0x2b2   :  { %s480_s6 = scalar_lea.hbm %s637_s7, 64 }
 0x2b3   :  { %p481_p13 = scmp.ne.s32.totalorder %s637_s7, %s480_s6  ;;  %p484_p0 = scmp.lt.u32.totalorder %s480_s6, %s637_s7 }
 0x2b5   :  { %p486_p1 = pnand %p484_p0, %p481_p13 }
 0x2b7   :  { %489 = shalt.err (!%p486_p1)
}
 0x2b8   :  { %s501_s11 = smov 64   ;;  %s502_s12 = smov 4  }
 0x2b9   :  { %323 = dma.vmem_to_hbm [thread:$0]  %s318_s27, 64, %s637_s7, [#allocation4], %s501_s11, %s501_s11, %s502_s12  }
 0x2ba   :  { %492 = dma.done.wait [#allocation4], 128  }
 0x2bb   :  { %493 = vsyncadd [#allocation4], 4294967168 }
 0x2bc   :  { %327 = vsyncpa [#allocation3], 1 }
 0x2bd   :  { %328 = vsyncpa [#allocation4], 1 }

// kernel: tpu_custom_call.1
= control target key start
LH: loop header
LB: loop body
LE: loop exit
PB: predicated region body
PF: predicated region fallthrough
CT: control target
= control target key end

     0   :  { %12 = vsyncpa [#allocation3], 0  ;;  %s630_s0 = inlined_call_operand.vmem [shape: f32[4,32], index: 0, kind: input, shape index: {}]   ;;  %s631_s1 = inlined_call_operand.hbm [shape: f32[32,64], index: 1, kind: input, shape index: {}]   ;;  %s632_s2 = inlined_call_operand.vmem [shape: f32[1,64], index: 2, kind: input, shape index: {}]   ;;  %s633_s3 = inlined_call_operand.vmem [shape: f32[64,64], index: 3, kind: input, shape index: {}]   ;;  %s634_s4 = inlined_call_operand.vmem [shape: f32[1,64], index: 4, kind: input, shape index: {}]   ;;  %s635_s5 = inlined_call_operand.vmem [shape: f32[64,16], index: 5, kind: input, shape index: {}]   ;;  %s636_s6 = inlined_call_operand.vmem [shape: f32[1,16], index: 6, kind: input, shape index: {}]   ;;  %s637_s7 = inlined_call_operand.hbm [shape: f32[4,16], index: 7, kind: output, shape index: {}]  }
   0x1   :  { %13 = vsyncpa [#allocation4], 0  ;;  %s494_s24 = smov [#allocation2]   ;;  %s446_s28 = scalar_lea.hbm %s631_s1, 512 }
   0x2   :  { %s21_s25 = sshll.u32 %s494_s24, 4  ;;  %p447_p0 = scmp.ne.s32.totalorder %s631_s1, %s446_s28  ;;  %s22_s25 = int_to_ptr.vmem [resolvable:$true] %s21_s25 }
   0x3   :  { %p450_p1 = scmp.lt.u32.totalorder %s446_s28, %s631_s1 }
   0x5   :  { %p452_p2 = pnand %p450_p1, %p447_p0 }
   0x7   :  { %455 = shalt.err (!%p452_p2)
}
   0x8   :  { %s456_s10 = scalar_lea.vmem %s22_s25, 512  ;;  %p461_p4 = scmp.lt.s32.totalorder %s22_s25, %s22_s25 }
   0x9   :  { %p457_p3 = scmp.ne.s32.totalorder %s22_s25, %s456_s10  ;;  %p462_p5 = scmp.lt.s32.totalorder %s456_s10, %s456_s10 }
   0xb   :  { %p463_p6 = por %p462_p5, %p461_p4 }
   0xd   :  { %p464_p7 = pnand %p463_p6, %p457_p3 }
   0xf   :  { %467 = shalt.err (!%p464_p7)
}
  0x10   :  { %s495_s11 = smov 128   ;;  %s496_s12 = smov 8  }
  0x11   :  { %27 = dma.hbm_to_vmem [thread:$0]  %s631_s1, 512, %s22_s25, [#allocation3], %s495_s11, %s495_s11, %s496_s12  }
  0x12   :  { %490 = dma.done.wait [#allocation3], 512  }
  0x13   :  { %491 = vsyncadd [#allocation3], 4294966784  ;;  %v497_v0 = vmov 0.0|0.0   ;;  %vm498_vm0 = vmmov 0   ;;  %v499_v1 = vmov 0.0   ;;  %v42_v2 = vld [vmem:[#allocation2] sm:$0xff] }
  0x14   :  { %407 = vmatprep.subr.bf16.mxu0 %v497_v0  ;;  %366 = vmatprep.mubr.msk.f32.mxu0 %vm498_vm0, %v499_v1  ;;  %v43_v3 = vld [vmem:[#allocation2 + $0x8] sm:$0xff]  ;;  %v44_v4 = vld [vmem:[#allocation2 + $0x10] sm:$0xff]  ;;  %v45_v6 = vld [vmem:[#allocation2 + $0x18] sm:$0xff]  ;;  %vm53_vm1 = vcmask 261120   ;;  %vm145_vm3 = vcmask 523264   ;;  %vm310_vm5 = vcmask 130048  }
  0x15   :  { %413 = vmatprep.subr.bf16.mxu1 %v497_v0  ;;  %385 = vmatprep.mubr.msk.f32.mxu1 %vm498_vm0, %v499_v1  ;;  %v408_v5 = vpack.c.bf16 %v43_v3, %v42_v2  ;;  %v130_v7 = vld [vmem:[%s633_s3] sm:$0xff]  ;;  %v131_v8 = vld [vmem:[%s633_s3 + $0x8] sm:$0xff]  ;;  %v132_v9 = vld [vmem:[%s633_s3 + $0x10] sm:$0xff]  ;;  %v411_v11 = vpack.c.bf16 %v45_v6, %v44_v4 }
  0x16   :  { %v133_v10 = vld [vmem:[%s633_s3 + $0x18] sm:$0xff]  ;;  %v414_v12 = vpack.c.bf16 %v131_v8, %v130_v7  ;;  %v134_v14 = vld [vmem:[%s633_s3 + $0x20] sm:$0xff]  ;;  %v135_v15 = vld [vmem:[%s633_s3 + $0x28] sm:$0xff] }
  0x17   :  { %409 = vmatpush3.bf16.msra.mxu0 %v408_v5  ;;  %v417_v13 = vpack.c.bf16 %v133_v10, %v132_v9  ;;  %v41_v16 = vld [vmem:[%s630_s0] sm:$0xff]  ;;  %v420_v17 = vpack.c.bf16 %v135_v15, %v134_v14  ;;  %v136_v18 = vld [vmem:[%s633_s3 + $0x30] sm:$0xff]  ;;  %v137_v19 = vld [vmem:[%s633_s3 + $0x38] sm:$0xff] }
  0x18   :  { %410 = vmatprep.subr.bf16.mxu0 %v497_v0  ;;  %415 = vmatpush3.bf16.msra.mxu1 %v414_v12  ;;  %v423_v20 = vpack.c.bf16 %v137_v19, %v136_v18  ;;  %v222_v21 = vld [vmem:[%s635_s5] sm:$0xff]  ;;  %v223_v22 = vld [vmem:[%s635_s5 + $0x8] sm:$0xff]  ;;  %v224_v23 = vld [vmem:[%s635_s5 + $0x10] sm:$0xff] }
  0x19   :  { %416 = vmatprep.subr.bf16.mxu1 %v497_v0  ;;  %v426_v24 = vpack.c.bf16 %v223_v22, %v222_v21  ;;  %v225_v25 = vld [vmem:[%s635_s5 + $0x18] sm:$0xff]  ;;  %v226_v27 = vld [vmem:[%s635_s5 + $0x20] sm:$0xff]  ;;  %v227_v28 = vld [vmem:[%s635_s5 + $0x28] sm:$0xff] }
  0x1a   :  { %v429_v26 = vpack.c.bf16 %v225_v25, %v224_v23  ;;  %v432_v29 = vpack.c.bf16 %v227_v28, %v226_v27  ;;  %v329_v30 = vld [vmem:[%s632_s2] ss:$0 sm:$0xff]  ;;  %v228_v36 = vld [vmem:[%s635_s5 + $0x30] sm:$0xff]  ;;  %v229_v37 = vld [vmem:[%s635_s5 + $0x38] sm:$0xff] }
  0x1b   :  { %412 = vmatpush3.bf16.msra.mxu0 %v411_v11  ;;  %v435_v38 = vpack.c.bf16 %v229_v37, %v228_v36  ;;  %v331_v39 = vld [vmem:[%s634_s4] ss:$0 sm:$0xff] }
  0x1c   :  { %425 = vmatprep.subr.bf16.mxu0 %v497_v0  ;;  %418 = vmatpush3.bf16.msra.mxu1 %v417_v13  ;;  %v333_v45 = vld [vmem:[%s636_s6] ss:$0 sm:$0xff] }
  0x1d   :  { %419 = vmatprep.subr.bf16.mxu1 %v497_v0 }
  0x1e   :  { %367 = vmatmul.mubr.msk.f32.vlgmr.msra.gmra.mrb[0].mxu0 %vm53_vm1, %v41_v16 }
  0x1f   :  { %404 = vmatprep.mubr.msk.f32.mxu0 %vm498_vm0, %v499_v1  ;;  %427 = vmatpush3.bf16.msra.mxu0 %v426_v24 }
  0x20   :  { %421 = vmatpush3.bf16.msra.mxu1 %v420_v17  ;;  %428 = vmatprep.subr.bf16.mxu0 %v497_v0 }
  0x21   :  { %422 = vmatprep.subr.bf16.mxu1 %v497_v0 }
  0x23   :  { %430 = vmatpush3.bf16.msra.mxu0 %v429_v26 }
  0x24   :  { %424 = vmatpush3.bf16.msra.mxu1 %v423_v20  ;;  %431 = vmatprep.subr.bf16.mxu0 %v497_v0 }
  0x27   :  { %433 = vmatpush3.bf16.msra.mxu0 %v432_v29 }
  0x28   :  { %434 = vmatprep.subr.bf16.mxu0 %v497_v0 }
  0x2b   :  { %436 = vmatpush3.bf16.msra.mxu0 %v435_v38 }
  0xf1   :  { %v123_v31 = vpop.f32.mrb[0].mxu0 }
  0xf2   :  { %v124_v32 = vadd.f32 %v329_v30, %v123_v31  ;;  %v368_v33 = vpop.f32.mrb[1].mxu0 }
  0xf4   :  { %vm127_vm2 = vcmp.gt.f32.partialorder %v124_v32, 0.0  ;;  %v128_v34 = vmul.f32 0.01, %v124_v32 }
  0xf6   :  { %v129_v35 = vsel %vm127_vm2, %v124_v32, %v128_v34 }
  0xf7   :  { %386 = vmatmul.mubr.msk.f32.vlgmr.msra.gmra.mrb[0].mxu1 %vm145_vm3, %v129_v35 }
 0x1ca   :  { %v215_v40 = vpop.f32.mrb[0].mxu1 }
 0x1cb   :  { %v216_v41 = vadd.f32 %v331_v39, %v215_v40  ;;  %v387_v42 = vpop.f32.mrb[1].mxu1 }
 0x1cd   :  { %vm219_vm4 = vcmp.gt.f32.partialorder %v216_v41, 0.0  ;;  %v220_v43 = vmul.f32 0.01, %v216_v41 }
 0x1cf   :  { %v221_v44 = vsel %vm219_vm4, %v216_v41, %v220_v43 }
 0x1d0   :  { %405 = vmatmul.mubr.msk.f32.vlgmr.msra.gmra.mrb[2].mxu0 %vm145_vm3, %v221_v44 }
 0x2a3   :  { %v306_v46 = vpop.f32.mrb[2].mxu0 }
 0x2a4   :  { %v307_v47 = vadd.f32 %v333_v45, %v306_v46  ;;  %v406_v48 = vpop.f32.mrb[3].mxu0 }
 0x2a6   :  { %311 = vst.msk [vmem:[#allocation5] sm:$0xff] %vm310_vm5, %v307_v47 }
 0x2a7   :  { %316 = vsyncadd [#allocation4], 64  ;;  %s500_s5 = smov [#allocation5]  }
 0x2a8   :  { %s317_s27 = sshll.u32 %s500_s5, 4  ;;  %s318_s27 = int_to_ptr.vmem [resolvable:$true] %s317_s27 }
 0x2a9   :  { %s468_s4 = scalar_lea.vmem %s318_s27, 64  ;;  %s472_s28 = scalar_lea.vmem %s318_s27, 128 }
 0x2aa   :  { %p469_p8 = scmp.ne.s32.totalorder %s318_s27, %s468_s4  ;;  %p473_p9 = scmp.lt.s32.totalorder %s318_s27, %s318_s27 }
 0x2ab   :  { %p474_p10 = scmp.lt.s32.totalorder %s472_s28, %s468_s4 }
 0x2ad   :  { %p475_p11 = por %p474_p10, %p473_p9 }
 0x2af   :  { %p476_p12 = pnand %p475_p11, %p469_p8 }
 0x2b1   :  { %479 = shalt.err (!%p476_p12)
}
 0x2b2   :  { %s480_s6 = scalar_lea.hbm %s637_s7, 64 }
 0x2b3   :  { %p481_p13 = scmp.ne.s32.totalorder %s637_s7, %s480_s6  ;;  %p484_p0 = scmp.lt.u32.totalorder %s480_s6, %s637_s7 }
 0x2b5   :  { %p486_p1 = pnand %p484_p0, %p481_p13 }
 0x2b7   :  { %489 = shalt.err (!%p486_p1)
}
 0x2b8   :  { %s501_s11 = smov 64   ;;  %s502_s12 = smov 4  }
 0x2b9   :  { %323 = dma.vmem_to_hbm [thread:$0]  %s318_s27, 64, %s637_s7, [#allocation4], %s501_s11, %s501_s11, %s502_s12  }
 0x2ba   :  { %492 = dma.done.wait [#allocation4], 128  }
 0x2bb   :  { %493 = vsyncadd [#allocation4], 4294967168 }
 0x2bc   :  { %327 = vsyncpa [#allocation3], 1 }
 0x2bd   :  { %328 = vsyncpa [#allocation4], 1 }

</bundles_post_ra>
